<compile_context>
chip_gen: v6e
topology: v6e:2x2x1
jax: 0.10.0
libtpu: 0.0.40
codegen_flags: <defaults>
</compile_context>

<pallas_src>
import jax
import jax.numpy as jnp
from jax.experimental import pallas as pl
from jax.experimental.pallas import tpu as pltpu

_MIB = 1024 * 1024


def _round_up(v, m):
    return ((v + m - 1) // m) * m


def _vmem_capacity_bytes():
    try:
        return int(pltpu.get_tpu_info().vmem_capacity_bytes)
    except Exception:
        return 64 * _MIB  # v7x floor -> conservative on every generation


# ---------------------------------------------------------------------------
# Kernel: one (TM, Dp) row tile x one TH hidden chunk per grid step.
#   acc[i] += gelu(x[i] @ W1[:, h_chunk] + b1[h_chunk]) @ W2[h_chunk, :]
# ---------------------------------------------------------------------------
def _mlp_kernel(x_ref, w1_ref, b1_ref, w2_ref, b2_ref, o_ref, acc_ref):
    h_idx = pl.program_id(1)

    @pl.when(h_idx == 0)
    def _init():
        acc_ref[...] = jnp.zeros_like(acc_ref)

    # fc1 chunk: bf16 MXU operands, f32 accumulation + f32 bias add.
    h = jnp.dot(x_ref[...], w1_ref[...], preferred_element_type=jnp.float32)
    h = h + b1_ref[...]
    # TODO(synk): PyTorch nn.GELU() default is erf-exact; tanh-approx GELU
    # (EUP tanh) is used here — max abs difference < 4e-3.
    h = jax.nn.gelu(h, approximate=True)
    # fc2 chunk, accumulated into f32 VMEM scratch.
    acc_ref[...] += jnp.dot(h.astype(jnp.bfloat16), w2_ref[...],
                            preferred_element_type=jnp.float32)

    @pl.when(h_idx == pl.num_programs(1) - 1)
    def _finalize():
        # Dropout(p=0.0) is the identity in the forward pass.
        o_ref[...] = (acc_ref[...] + b2_ref[...]).astype(o_ref.dtype)


# ---------------------------------------------------------------------------
# One-time weight prep: pad to lane-dense shapes, pre-cast to bf16, pick the
# hidden chunk size TH from the VMEM budget.  Hoisted out of the hot path.
# ---------------------------------------------------------------------------
def prepare_mlp_params(w1, b1, w2, b2, *, max_block_m=512, hidden_block=None):
    D, H = w1.shape
    H2, Dout = w2.shape
    assert H2 == H and b1.shape == (H,) and b2.shape == (Dout,)

    Dp = _round_up(D, 128)
    Hp = _round_up(H, 128)
    Dop = _round_up(Dout, 128)

    vmem_cap = _vmem_capacity_bytes()
    budget = int(0.65 * vmem_cap)

    def need_bytes(th, n_h):
        wbuf = 1 if n_h == 1 else 2                 # weight-chunk buffers (bf16)
        tm = max_block_m
        weights = wbuf * (Dp * th + th * Dop) * 2
        biases = wbuf * th * 4 + Dop * 4
        x_tiles = 2 * tm * Dp * 2                   # bf16, double-buffered
        out_tiles = 2 * tm * Dop * 4                # f32, double-buffered
        acc = tm * Dop * 4
        interm = tm * th * (4 + 2)                  # f32 h + bf16 copy
        return weights + biases + x_tiles + out_tiles + acc + interm

    if hidden_block is not None:
        TH = _round_up(hidden_block, 128)
    else:
        TH = 128
        for cand in (Hp, 4096, 2048, 1024, 512, 256, 128):
            if cand > Hp:
                continue
            if need_bytes(cand, pl.cdiv(Hp, cand)) <= budget:
                TH = cand
                break
    Hpp = _round_up(Hp, TH)
    n_h = Hpp // TH

    # Zero padding is numerically inert for an MLP (gelu(0)=0, zero weight
    # rows/cols contribute nothing); padded rows are sliced off after the call.
    w1p = jnp.pad(w1, ((0, Dp - D), (0, Hpp - H))).astype(jnp.bfloat16)
    b1p = jnp.pad(b1, (0, Hpp - H)).reshape(1, Hpp).astype(jnp.float32)
    w2p = jnp.pad(w2, ((0, Hpp - H), (0, Dop - Dout))).astype(jnp.bfloat16)
    b2p = jnp.pad(b2, (0, Dop - Dout)).reshape(1, Dop).astype(jnp.float32)

    vmem_limit = int(min(max(need_bytes(TH, n_h) * 1.25, 32 * _MIB),
                         0.9 * vmem_cap))

    return dict(w1p=w1p, b1p=b1p, w2p=w2p, b2p=b2p,
                D=D, H=H, Dout=Dout, Dp=Dp, Hpp=Hpp, Dop=Dop,
                TH=TH, n_h=n_h, vmem_limit=vmem_limit,
                max_block_m=max_block_m)


def _build_call(TM, Dp, TH, Dop, grid, Mp, out_dtype, vmem_limit, cost,
                single_buffer_weights):
    def wspec(shape, index_map):
        if single_buffer_weights:
            return pl.BlockSpec(shape, index_map, pipeline_mode=pl.Buffered(1))
        return pl.BlockSpec(shape, index_map)

    return pl.pallas_call(
        _mlp_kernel,
        out_shape=jax.ShapeDtypeStruct((Mp, Dop), out_dtype),
        grid_spec=pltpu.PrefetchScalarGridSpec(
            num_scalar_prefetch=0,
            grid=grid,
            in_specs=[
                pl.BlockSpec((TM, Dp), lambda i, h: (i, 0)),   # x: row-tiled
                wspec((Dp, TH), lambda i, h: (0, h)),          # W1 chunk
                wspec((1, TH), lambda i, h: (0, h)),           # b1 chunk
                wspec((TH, Dop), lambda i, h: (h, 0)),         # W2 chunk
                wspec((1, Dop), lambda i, h: (0, 0)),          # b2
            ],
            out_specs=pl.BlockSpec((TM, Dop), lambda i, h: (i, 0)),
            scratch_shapes=[pltpu.VMEM((TM, Dop), jnp.float32)],
        ),
        compiler_params=pltpu.CompilerParams(
            dimension_semantics=("parallel", "arbitrary"),
            vmem_limit_bytes=vmem_limit),
        cost_estimate=cost,
    )


# ---------------------------------------------------------------------------
# Per-call wrapper: flatten leading dims, pad rows, pre-cast x to bf16, launch.
# ---------------------------------------------------------------------------
def mlp_forward(x, params, *, block_m=None, out_dtype=None):
    D, H, Dout = params["D"], params["H"], params["Dout"]
    Dp, Hpp, Dop = params["Dp"], params["Hpp"], params["Dop"]
    TH, n_h = params["TH"], params["n_h"]
    if block_m is None:
        block_m = params["max_block_m"]
    if out_dtype is None:
        out_dtype = x.dtype

    orig_shape = x.shape
    assert orig_shape[-1] == D
    M = 1
    for s in orig_shape[:-1]:
        M *= s
    x2 = x.reshape(M, D)

    # Adaptive row tile (multiples of 16 for bf16 sublane packing): minimize
    # padded/wasted rows, ties -> larger tile.
    cands = {c for c in (64, 128, 256, 512) if c <= block_m}
    if _round_up(M, 16) <= block_m:
        cands.add(_round_up(M, 16))
    if not cands:
        cands = {_round_up(min(M, block_m), 16)}
    TM = min(sorted(cands), key=lambda c: ((-M) % c, -c))
    Mp = _round_up(M, TM)

    # Pre-cast the activation stream to bf16 (MXU operand dtype) -> half DMA.
    x2p = jnp.pad(x2, ((0, Mp - M), (0, Dp - D))).astype(jnp.bfloat16)

    out_bytes = jnp.dtype(out_dtype).itemsize
    cost = pl.CostEstimate(
        flops=2 * M * (D * H + H * Dout),
        transcendentals=M * H,
        bytes_accessed=(M * D * 2 + (D * H + H * Dout) * 2
                        + (H + Dout) * 4 + M * Dout * out_bytes))

    grid = (Mp // TM, n_h)
    single_buffer = (n_h == 1)   # weights grid-invariant -> no double buffer
    args = (x2p, params["w1p"], params["b1p"], params["w2p"], params["b2p"])

    call = _build_call(TM, Dp, TH, Dop, grid, Mp, out_dtype,
                       params["vmem_limit"], cost, single_buffer)
    if single_buffer:
        try:
            out = call(*args)
        except Exception:
            # TODO(synk): pl.Buffered(1) unsupported on this jax/libtpu combo;
            # fall back to default double-buffered (resident) weight blocks.
            call = _build_call(TM, Dp, TH, Dop, grid, Mp, out_dtype,
                               params["vmem_limit"], cost, False)
            out = call(*args)
    else:
        out = call(*args)

    out = out[:M, :Dout]
    return out.reshape(orig_shape[:-1] + (Dout,))


# ---------------------------------------------------------------------------
# Pure-JAX reference (same tanh-approx GELU; f32 matmuls).
# ---------------------------------------------------------------------------
def mlp_ref(x, w1, b1, w2, b2):
    h = jax.nn.gelu(x @ w1 + b1, approximate=True)
    return h @ w2 + b2


def _rand_mlp(key, D, H, Dout):
    k = jax.random.split(key, 4)
    w1 = jax.random.normal(k[0], (D, H), jnp.float32) * (1.0 / jnp.sqrt(D))
    b1 = jax.random.normal(k[1], (H,), jnp.float32) * 0.01
    w2 = jax.random.normal(k[2], (H, Dout), jnp.float32) * (1.0 / jnp.sqrt(H))
    b2 = jax.random.normal(k[3], (Dout,), jnp.float32) * 0.01
    return w1, b1, w2, b2


if __name__ == "__main__":
    key = jax.random.PRNGKey(0)
    ks = jax.random.split(key, 8)

    # --- 1) small module-consistent shapes: (B, N, D)=(2, 8, 32), hidden=128 --
    B, N, Din, Hf, Dout = 2, 8, 32, 128, 32
    x = jax.random.normal(ks[0], (B, N, Din), jnp.float32)
    w1, b1, w2, b2 = _rand_mlp(ks[1], Din, Hf, Dout)
    params = prepare_mlp_params(w1, b1, w2, b2)
    out = jax.block_until_ready(mlp_forward(x, params))
    ref = mlp_ref(x, w1, b1, w2, b2)
    assert out.shape == ref.shape
    err = float(jnp.max(jnp.abs(out - ref)))
    assert jnp.allclose(out, ref, atol=5e-2, rtol=5e-2), f"small mismatch {err}"

    # --- 2) multi-row-tile test: M=640 -> grid rows > 1 (pipeline exercised) --
    B2, N2, D2, H2 = 4, 160, 256, 512
    x2 = jax.random.normal(ks[2], (B2, N2, D2), jnp.float32)
    w1b, b1b, w2b, b2b = _rand_mlp(ks[3], D2, H2, D2)
    params2 = prepare_mlp_params(w1b, b1b, w2b, b2b)
    out2 = jax.block_until_ready(mlp_forward(x2, params2))
    ref2 = mlp_ref(x2, w1b, b1b, w2b, b2b)
    err2 = float(jnp.max(jnp.abs(out2 - ref2)))
    assert jnp.allclose(out2, ref2, atol=5e-2, rtol=5e-2), f"tiled mismatch {err2}"

    # --- 3) hidden-dim-tiled test: force TH=128 over H=384 -> 3 h-chunks ------
    B3, N3, D3, H3, Do3 = 2, 40, 256, 384, 192
    x3 = jax.random.normal(ks[4], (B3, N3, D3), jnp.float32)
    w1c, b1c, w2c, b2c = _rand_mlp(ks[5], D3, H3, Do3)
    params3 = prepare_mlp_params(w1c, b1c, w2c, b2c, hidden_block=128)
    assert params3["n_h"] == 3
    out3 = jax.block_until_ready(mlp_forward(x3, params3))
    ref3 = mlp_ref(x3, w1c, b1c, w2c, b2c)
    err3 = float(jnp.max(jnp.abs(out3 - ref3)))
    assert jnp.allclose(out3, ref3, atol=5e-2, rtol=5e-2), f"h-tiled mismatch {err3}"

    print("KERNEL_OK")
</pallas_src>

<mosaic_0001>
module attributes {stable_mosaic.version = 11 : i64} {
  func.func @_mlp_kernel(%arg0: i32, %arg1: i32, %arg2: memref<16x128xbf16, #tpu.memory_space<vmem>>, %arg3: memref<128x128xbf16, #tpu.memory_space<vmem>>, %arg4: memref<1x128xf32, #tpu.memory_space<vmem>>, %arg5: memref<128x128xbf16, #tpu.memory_space<vmem>>, %arg6: memref<1x128xf32, #tpu.memory_space<vmem>>, %arg7: memref<16x128xf32, #tpu.memory_space<vmem>>, %arg8: memref<16x128xf32, #tpu.memory_space<vmem>>) attributes {dimension_semantics = [#tpu.dimension_semantics<parallel>, #tpu.dimension_semantics<arbitrary>], iteration_bounds = array<i64: 1, 1>, scalar_prefetch = 0 : i64, scratch_operands = 1 : i64, tpu.core_type = #tpu.core_type<tc>, window_params = [{transform_indices = @transform_0, window_bounds = array<i64: 16, 128>}, {pipeline_mode = #tpu.pipeline_mode<synchronous>, transform_indices = @transform_1, window_bounds = array<i64: 128, 128>}, {pipeline_mode = #tpu.pipeline_mode<synchronous>, transform_indices = @transform_2, window_bounds = array<i64: 1, 128>}, {pipeline_mode = #tpu.pipeline_mode<synchronous>, transform_indices = @transform_3, window_bounds = array<i64: 128, 128>}, {pipeline_mode = #tpu.pipeline_mode<synchronous>, transform_indices = @transform_4, window_bounds = array<i64: 1, 128>}, {transform_indices = @transform_5, window_bounds = array<i64: 16, 128>}]} {
    %c0_i32 = arith.constant 0 : i32
    %0 = arith.cmpi eq, %arg1, %c0_i32 : i32
    %1 = arith.extui %0 : i1 to i32
    %c0_i32_0 = arith.constant 0 : i32
    %2 = arith.cmpi ne, %1, %c0_i32_0 : i32
    scf.if %2 {
      %cst_19 = arith.constant 0.000000e+00 : f32
      %31 = vector.broadcast %cst_19 : f32 to vector<16x128xf32>
      %c0_20 = arith.constant 0 : index
      %c0_21 = arith.constant 0 : index
      %32 = vector.load %arg8[%c0_20, %c0_21] : memref<16x128xf32, #tpu.memory_space<vmem>>, vector<16x128xf32>
      tpu.vector_store %arg8[%c0_20, %c0_21], %31 {strides = array<i32>} : memref<16x128xf32, #tpu.memory_space<vmem>>, vector<16x128xf32>,
    } else {
    }
    %c0 = arith.constant 0 : index
    %c0_1 = arith.constant 0 : index
    %3 = vector.load %arg2[%c0, %c0_1] : memref<16x128xbf16, #tpu.memory_space<vmem>>, vector<16x128xbf16>
    %c0_2 = arith.constant 0 : index
    %c0_3 = arith.constant 0 : index
    %4 = vector.load %arg3[%c0_2, %c0_3] : memref<128x128xbf16, #tpu.memory_space<vmem>>, vector<128x128xbf16>
    %cst = arith.constant dense<0.000000e+00> : vector<16x128xf32>
    %5 = tpu.matmul %3, %4, %cst {dimension_numbers = #tpu.dot_dimension_numbers<[1], [0], [0], [1], [0, 0, 1, 1], [], []>} : vector<16x128xbf16>, vector<128x128xbf16>, vector<16x128xf32> -> vector<16x128xf32>
    %c0_4 = arith.constant 0 : index
    %c0_5 = arith.constant 0 : index
    %6 = vector.load %arg4[%c0_4, %c0_5] : memref<1x128xf32, #tpu.memory_space<vmem>>, vector<1x128xf32>
    %7 = vector.broadcast %6 : vector<1x128xf32> to vector<16x128xf32>
    %8 = arith.addf %5, %7 : vector<16x128xf32>
    %9 = arith.mulf %8, %8 : vector<16x128xf32>
    %10 = arith.mulf %8, %9 : vector<16x128xf32>
    %cst_6 = arith.constant 4.471500e-02 : f32
    %11 = vector.broadcast %cst_6 : f32 to vector<16x128xf32>
    %12 = arith.mulf %11, %10 : vector<16x128xf32>
    %13 = arith.addf %8, %12 : vector<16x128xf32>
    %cst_7 = arith.constant 0.797884583 : f32
    %14 = vector.broadcast %cst_7 : f32 to vector<16x128xf32>
    %15 = arith.mulf %14, %13 : vector<16x128xf32>
    %16 = math.tanh %15 : vector<16x128xf32>
    %cst_8 = arith.constant 1.000000e+00 : f32
    %17 = vector.broadcast %cst_8 : f32 to vector<16x128xf32>
    %18 = arith.addf %17, %16 : vector<16x128xf32>
    %cst_9 = arith.constant 5.000000e-01 : f32
    %19 = vector.broadcast %cst_9 : f32 to vector<16x128xf32>
    %20 = arith.mulf %19, %18 : vector<16x128xf32>
    %21 = arith.mulf %8, %20 : vector<16x128xf32>
    %c0_10 = arith.constant 0 : index
    %c0_11 = arith.constant 0 : index
    %22 = vector.load %arg8[%c0_10, %c0_11] : memref<16x128xf32, #tpu.memory_space<vmem>>, vector<16x128xf32>
    %23 = arith.truncf %21 : vector<16x128xf32> to vector<16x128xbf16>
    %c0_12 = arith.constant 0 : index
    %c0_13 = arith.constant 0 : index
    %24 = vector.load %arg5[%c0_12, %c0_13] : memref<128x128xbf16, #tpu.memory_space<vmem>>, vector<128x128xbf16>
    %cst_14 = arith.constant dense<0.000000e+00> : vector<16x128xf32>
    %25 = tpu.matmul %23, %24, %cst_14 {dimension_numbers = #tpu.dot_dimension_numbers<[1], [0], [0], [1], [0, 0, 1, 1], [], []>} : vector<16x128xbf16>, vector<128x128xbf16>, vector<16x128xf32> -> vector<16x128xf32>
    %26 = arith.addf %22, %25 : vector<16x128xf32>
    %c0_15 = arith.constant 0 : index
    %c0_16 = arith.constant 0 : index
    %27 = vector.load %arg8[%c0_15, %c0_16] : memref<16x128xf32, #tpu.memory_space<vmem>>, vector<16x128xf32>
    tpu.vector_store %arg8[%c0_15, %c0_16], %26 {strides = array<i32>} : memref<16x128xf32, #tpu.memory_space<vmem>>, vector<16x128xf32>,
    %c0_i32_17 = arith.constant 0 : i32
    %28 = arith.cmpi eq, %arg1, %c0_i32_17 : i32
    %29 = arith.extui %28 : i1 to i32
    %c0_i32_18 = arith.constant 0 : i32
    %30 = arith.cmpi ne, %29, %c0_i32_18 : i32
    scf.if %30 {
      %c0_19 = arith.constant 0 : index
      %c0_20 = arith.constant 0 : index
      %31 = vector.load %arg8[%c0_19, %c0_20] : memref<16x128xf32, #tpu.memory_space<vmem>>, vector<16x128xf32>
      %c0_21 = arith.constant 0 : index
      %c0_22 = arith.constant 0 : index
      %32 = vector.load %arg6[%c0_21, %c0_22] : memref<1x128xf32, #tpu.memory_space<vmem>>, vector<1x128xf32>
      %33 = vector.broadcast %32 : vector<1x128xf32> to vector<16x128xf32>
      %34 = arith.addf %31, %33 : vector<16x128xf32>
      %c0_23 = arith.constant 0 : index
      %c0_24 = arith.constant 0 : index
      %35 = vector.load %arg7[%c0_23, %c0_24] : memref<16x128xf32, #tpu.memory_space<vmem>>, vector<16x128xf32>
      tpu.vector_store %arg7[%c0_23, %c0_24], %34 {strides = array<i32>} : memref<16x128xf32, #tpu.memory_space<vmem>>, vector<16x128xf32>,
    } else {
    }
    return
  }
  func.func @transform_0(%arg0: i32, %arg1: i32) -> (i32, i32) {
    %c0_i32 = arith.constant 0 : i32
    %c0_i32_0 = arith.constant 0 : i32
    return %arg0, %c0_i32 : i32, i32
  }
  func.func @transform_1(%arg0: i32, %arg1: i32) -> (i32, i32) {
    %c0_i32 = arith.constant 0 : i32
    %c0_i32_0 = arith.constant 0 : i32
    return %c0_i32, %arg1 : i32, i32
  }
  func.func @transform_2(%arg0: i32, %arg1: i32) -> (i32, i32) {
    %c0_i32 = arith.constant 0 : i32
    %c0_i32_0 = arith.constant 0 : i32
    return %c0_i32, %arg1 : i32, i32
  }
  func.func @transform_3(%arg0: i32, %arg1: i32) -> (i32, i32) {
    %c0_i32 = arith.constant 0 : i32
    %c0_i32_0 = arith.constant 0 : i32
    return %arg1, %c0_i32 : i32, i32
  }
  func.func @transform_4(%arg0: i32, %arg1: i32) -> (i32, i32) {
    %c0_i32 = arith.constant 0 : i32
    %c0_i32_0 = arith.constant 0 : i32
    %c0_i32_1 = arith.constant 0 : i32
    return %c0_i32, %c0_i32_0 : i32, i32
  }
  func.func @transform_5(%arg0: i32, %arg1: i32) -> (i32, i32) {
    %c0_i32 = arith.constant 0 : i32
    %c0_i32_0 = arith.constant 0 : i32
    return %arg0, %c0_i32 : i32, i32
  }
}

module attributes {stable_mosaic.version = 11 : i64} {
  func.func @_mlp_kernel(%arg0: i32, %arg1: i32, %arg2: memref<16x128xbf16, #tpu.memory_space<vmem>>, %arg3: memref<128x128xbf16, #tpu.memory_space<vmem>>, %arg4: memref<1x128xf32, #tpu.memory_space<vmem>>, %arg5: memref<128x128xbf16, #tpu.memory_space<vmem>>, %arg6: memref<1x128xf32, #tpu.memory_space<vmem>>, %arg7: memref<16x128xf32, #tpu.memory_space<vmem>>, %arg8: memref<16x128xf32, #tpu.memory_space<vmem>>) attributes {dimension_semantics = [#tpu.dimension_semantics<parallel>, #tpu.dimension_semantics<arbitrary>], iteration_bounds = array<i64: 1, 1>, scalar_prefetch = 0 : i64, scratch_operands = 1 : i64, tpu.core_type = #tpu.core_type<tc>, window_params = [{transform_indices = @transform_0, window_bounds = array<i64: 16, 128>}, {transform_indices = @transform_1, window_bounds = array<i64: 128, 128>}, {transform_indices = @transform_2, window_bounds = array<i64: 1, 128>}, {transform_indices = @transform_3, window_bounds = array<i64: 128, 128>}, {pipeline_mode = #tpu.pipeline_mode<synchronous>, transform_indices = @transform_4, window_bounds = array<i64: 1, 128>}, {transform_indices = @transform_5, window_bounds = array<i64: 16, 128>}]} {
    %c0_i32 = arith.constant 0 : i32
    %0 = arith.cmpi eq, %arg1, %c0_i32 : i32
    %1 = arith.extui %0 : i1 to i32
    %c0_i32_0 = arith.constant 0 : i32
    %2 = arith.cmpi ne, %1, %c0_i32_0 : i32
    scf.if %2 {
      %cst_19 = arith.constant 0.000000e+00 : f32
      %31 = vector.broadcast %cst_19 : f32 to vector<16x128xf32>
      %c0_20 = arith.constant 0 : index
      %c0_21 = arith.constant 0 : index
      %32 = vector.load %arg8[%c0_20, %c0_21] : memref<16x128xf32, #tpu.memory_space<vmem>>, vector<16x128xf32>
      tpu.vector_store %arg8[%c0_20, %c0_21], %31 {strides = array<i32>} : memref<16x128xf32, #tpu.memory_space<vmem>>, vector<16x128xf32>,
    } else {
    }
    %c0 = arith.constant 0 : index
    %c0_1 = arith.constant 0 : index
    %3 = vector.load %arg2[%c0, %c0_1] : memref<16x128xbf16, #tpu.memory_space<vmem>>, vector<16x128xbf16>
    %c0_2 = arith.constant 0 : index
    %c0_3 = arith.constant 0 : index
    %4 = vector.load %arg3[%c0_2, %c0_3] : memref<128x128xbf16, #tpu.memory_space<vmem>>, vector<128x128xbf16>
    %cst = arith.constant dense<0.000000e+00> : vector<16x128xf32>
    %5 = tpu.matmul %3, %4, %cst {dimension_numbers = #tpu.dot_dimension_numbers<[1], [0], [0], [1], [0, 0, 1, 1], [], []>} : vector<16x128xbf16>, vector<128x128xbf16>, vector<16x128xf32> -> vector<16x128xf32>
    %c0_4 = arith.constant 0 : index
    %c0_5 = arith.constant 0 : index
    %6 = vector.load %arg4[%c0_4, %c0_5] : memref<1x128xf32, #tpu.memory_space<vmem>>, vector<1x128xf32>
    %7 = vector.broadcast %6 : vector<1x128xf32> to vector<16x128xf32>
    %8 = arith.addf %5, %7 : vector<16x128xf32>
    %9 = arith.mulf %8, %8 : vector<16x128xf32>
    %10 = arith.mulf %8, %9 : vector<16x128xf32>
    %cst_6 = arith.constant 4.471500e-02 : f32
    %11 = vector.broadcast %cst_6 : f32 to vector<16x128xf32>
    %12 = arith.mulf %11, %10 : vector<16x128xf32>
    %13 = arith.addf %8, %12 : vector<16x128xf32>
    %cst_7 = arith.constant 0.797884583 : f32
    %14 = vector.broadcast %cst_7 : f32 to vector<16x128xf32>
    %15 = arith.mulf %14, %13 : vector<16x128xf32>
    %16 = math.tanh %15 : vector<16x128xf32>
    %cst_8 = arith.constant 1.000000e+00 : f32
    %17 = vector.broadcast %cst_8 : f32 to vector<16x128xf32>
    %18 = arith.addf %17, %16 : vector<16x128xf32>
    %cst_9 = arith.constant 5.000000e-01 : f32
    %19 = vector.broadcast %cst_9 : f32 to vector<16x128xf32>
    %20 = arith.mulf %19, %18 : vector<16x128xf32>
    %21 = arith.mulf %8, %20 : vector<16x128xf32>
    %c0_10 = arith.constant 0 : index
    %c0_11 = arith.constant 0 : index
    %22 = vector.load %arg8[%c0_10, %c0_11] : memref<16x128xf32, #tpu.memory_space<vmem>>, vector<16x128xf32>
    %23 = arith.truncf %21 : vector<16x128xf32> to vector<16x128xbf16>
    %c0_12 = arith.constant 0 : index
    %c0_13 = arith.constant 0 : index
    %24 = vector.load %arg5[%c0_12, %c0_13] : memref<128x128xbf16, #tpu.memory_space<vmem>>, vector<128x128xbf16>
    %cst_14 = arith.constant dense<0.000000e+00> : vector<16x128xf32>
    %25 = tpu.matmul %23, %24, %cst_14 {dimension_numbers = #tpu.dot_dimension_numbers<[1], [0], [0], [1], [0, 0, 1, 1], [], []>} : vector<16x128xbf16>, vector<128x128xbf16>, vector<16x128xf32> -> vector<16x128xf32>
    %26 = arith.addf %22, %25 : vector<16x128xf32>
    %c0_15 = arith.constant 0 : index
    %c0_16 = arith.constant 0 : index
    %27 = vector.load %arg8[%c0_15, %c0_16] : memref<16x128xf32, #tpu.memory_space<vmem>>, vector<16x128xf32>
    tpu.vector_store %arg8[%c0_15, %c0_16], %26 {strides = array<i32>} : memref<16x128xf32, #tpu.memory_space<vmem>>, vector<16x128xf32>,
    %c0_i32_17 = arith.constant 0 : i32
    %28 = arith.cmpi eq, %arg1, %c0_i32_17 : i32
    %29 = arith.extui %28 : i1 to i32
    %c0_i32_18 = arith.constant 0 : i32
    %30 = arith.cmpi ne, %29, %c0_i32_18 : i32
    scf.if %30 {
      %c0_19 = arith.constant 0 : index
      %c0_20 = arith.constant 0 : index
      %31 = vector.load %arg8[%c0_19, %c0_20] : memref<16x128xf32, #tpu.memory_space<vmem>>, vector<16x128xf32>
      %c0_21 = arith.constant 0 : index
      %c0_22 = arith.constant 0 : index
      %32 = vector.load %arg6[%c0_21, %c0_22] : memref<1x128xf32, #tpu.memory_space<vmem>>, vector<1x128xf32>
      %33 = vector.broadcast %32 : vector<1x128xf32> to vector<16x128xf32>
      %34 = arith.addf %31, %33 : vector<16x128xf32>
      %c0_23 = arith.constant 0 : index
      %c0_24 = arith.constant 0 : index
      %35 = vector.load %arg7[%c0_23, %c0_24] : memref<16x128xf32, #tpu.memory_space<vmem>>, vector<16x128xf32>
      tpu.vector_store %arg7[%c0_23, %c0_24], %34 {strides = array<i32>} : memref<16x128xf32, #tpu.memory_space<vmem>>, vector<16x128xf32>,
    } else {
    }
    return
  }
  func.func @transform_0(%arg0: i32, %arg1: i32) -> (i32, i32) {
    %c0_i32 = arith.constant 0 : i32
    %c0_i32_0 = arith.constant 0 : i32
    return %arg0, %c0_i32 : i32, i32
  }
  func.func @transform_1(%arg0: i32, %arg1: i32) -> (i32, i32) {
    %c0_i32 = arith.constant 0 : i32
    %c0_i32_0 = arith.constant 0 : i32
    return %c0_i32, %arg1 : i32, i32
  }
  func.func @transform_2(%arg0: i32, %arg1: i32) -> (i32, i32) {
    %c0_i32 = arith.constant 0 : i32
    %c0_i32_0 = arith.constant 0 : i32
    return %c0_i32, %arg1 : i32, i32
  }
  func.func @transform_3(%arg0: i32, %arg1: i32) -> (i32, i32) {
    %c0_i32 = arith.constant 0 : i32
    %c0_i32_0 = arith.constant 0 : i32
    return %arg1, %c0_i32 : i32, i32
  }
  func.func @transform_4(%arg0: i32, %arg1: i32) -> (i32, i32) {
    %c0_i32 = arith.constant 0 : i32
    %c0_i32_0 = arith.constant 0 : i32
    %c0_i32_1 = arith.constant 0 : i32
    return %c0_i32, %c0_i32_0 : i32, i32
  }
  func.func @transform_5(%arg0: i32, %arg1: i32) -> (i32, i32) {
    %c0_i32 = arith.constant 0 : i32
    %c0_i32_0 = arith.constant 0 : i32
    return %arg0, %c0_i32 : i32, i32
  }
}

</mosaic_0001>

<bundles_post_ra>
// kernel: tpu_custom_call.1
= control target key start
LH: loop header
LB: loop body
LE: loop exit
PB: predicated region body
PF: predicated region fallthrough
CT: control target
= control target key end

     0   :  { %10 = vsyncpa [#allocation4], 0  ;;  %s605_s0 = inlined_call_operand.hbm [shape: bf16[16,128], index: 0, kind: input, shape index: {}]   ;;  %s606_s1 = inlined_call_operand.hbm [shape: bf16[128,128], index: 1, kind: input, shape index: {}]   ;;  %s607_s2 = inlined_call_operand.vmem [shape: f32[1,128], index: 2, kind: input, shape index: {}]   ;;  %s608_s3 = inlined_call_operand.hbm [shape: bf16[128,128], index: 3, kind: input, shape index: {}]   ;;  %s609_s4 = inlined_call_operand.vmem [shape: f32[1,128], index: 4, kind: input, shape index: {}]   ;;  %s610_s5 = inlined_call_operand.hbm [shape: f32[16,128], index: 5, kind: output, shape index: {}]  }
   0x1   :  { %11 = vsyncpa [#allocation7], 0 }
   0x2   :  { %12 = vsyncpa [#allocation5], 0  ;;  %s547_s18 = smov [#allocation6]   ;;  %s548_s20 = smov [#allocation3]  }
   0x3   :  { %s30_s19 = sshll.u32 %s547_s18, 4  ;;  %s18_s21 = sshll.u32 %s548_s20, 4  ;;  %s31_s19 = int_to_ptr.vmem [resolvable:$true] %s30_s19  ;;  %s19_s21 = int_to_ptr.vmem [resolvable:$true] %s18_s21 }
   0x4   :  { %s469_s22 = scalar_lea.vmem %s31_s19, 1024  ;;  %p474_p1 = scmp.lt.s32.totalorder %s31_s19, %s31_s19 }
   0x5   :  { %p470_p0 = scmp.ne.s32.totalorder %s31_s19, %s469_s22  ;;  %p475_p2 = scmp.lt.s32.totalorder %s469_s22, %s469_s22 }
   0x7   :  { %p476_p3 = por %p475_p2, %p474_p1 }
   0x9   :  { %p477_p4 = pnand %p476_p3, %p470_p0 }
   0xb   :  { %480 = shalt.err (!%p477_p4)
}
   0xc   :  { %s549_s23 = smov 64   ;;  %s550_s24 = smov 4  }
   0xd   :  { %36 = dma.hbm_to_vmem [thread:$0]  %s606_s1, 1024, %s31_s19, [#allocation7], %s549_s23, %s549_s23, %s550_s24  }
   0xe   :  { %s489_s27 = scalar_lea.vmem %s19_s21, 128  ;;  %p494_p6 = scmp.lt.s32.totalorder %s19_s21, %s19_s21 }
   0xf   :  { %p490_p5 = scmp.ne.s32.totalorder %s19_s21, %s489_s27  ;;  %p495_p7 = scmp.lt.s32.totalorder %s489_s27, %s489_s27 }
  0x11   :  { %p496_p8 = por %p495_p7, %p494_p6 }
  0x13   :  { %p497_p9 = pnand %p496_p8, %p490_p5 }
  0x15   :  { %500 = shalt.err (!%p497_p9)
}
  0x16   :  { %24 = dma.hbm_to_vmem [thread:$0]  %s605_s0, 128, %s19_s21, [#allocation4], %s549_s23, %s549_s23, %s550_s24  }
  0x17   :  { %s551_s30 = smov [#allocation8]  }
  0x18   :  { %s44_s6 = sshll.u32 %s551_s30, 4  ;;  %s45_s6 = int_to_ptr.vmem [resolvable:$true] %s44_s6 }
  0x19   :  { %s509_s7 = scalar_lea.vmem %s45_s6, 1024  ;;  %p514_p11 = scmp.lt.s32.totalorder %s45_s6, %s45_s6 }
  0x1a   :  { %p510_p10 = scmp.ne.s32.totalorder %s45_s6, %s509_s7  ;;  %p515_p12 = scmp.lt.s32.totalorder %s509_s7, %s509_s7 }
  0x1c   :  { %p516_p13 = por %p515_p12, %p514_p11 }
  0x1e   :  { %p517_p0 = pnand %p516_p13, %p510_p10 }
  0x20   :  { %520 = shalt.err (!%p517_p0)
}
  0x21   :  { %50 = dma.hbm_to_vmem [thread:$0]  %s608_s3, 1024, %s45_s6, [#allocation7], %s549_s23, %s549_s23, %s550_s24  }
  0x22   :  { %541 = dma.done.wait [#allocation4], 128  }
  0x23   :  { %542 = vsyncadd [#allocation4], 4294967168 }
  0x24   :  { %543 = dma.done.wait [#allocation7], 2048  }
  0x25   :  { %544 = vsyncadd [#allocation7], 4294965248  ;;  %v552_v0 = vmov 0.0   ;;  %vm553_vm0 = vmmov 0   ;;  %v440_v1 = vld [vmem:[#allocation6 + $0x38] sm:$0xff]   ;;  %v441_v2 = vld [vmem:[#allocation6 + $0x30] sm:$0xff]  }
  0x26   :  { %390 = vmatprep.subr.bf16.mxu0 %v552_v0  ;;  %406 = vmatprep.mubr.msk.bf16.mxu0 %vm553_vm0, %v552_v0  ;;  %v442_v3 = vld [vmem:[#allocation6 + $0x28] sm:$0xff]   ;;  %v443_v4 = vld [vmem:[#allocation6 + $0x20] sm:$0xff]   ;;  %v444_v5 = vld [vmem:[#allocation6 + $0x18] sm:$0xff]   ;;  %s554_s10 = smov [#allocation9]  }
  0x27   :  { %410 = vmatprep.subr.bf16.mxu1 %v552_v0  ;;  %426 = vmatprep.mubr.msk.bf16.mxu1 %vm553_vm0, %v552_v0  ;;  %v445_v6 = vld [vmem:[#allocation6 + $0x10] sm:$0xff]   ;;  %v446_v7 = vld [vmem:[#allocation6 + $0x8] sm:$0xff]   ;;  %v447_v8 = vld [vmem:[#allocation6] sm:$0xff]   ;;  %s340_s11 = sshll.u32 %s554_s10, 4  ;;  %s341_s11 = int_to_ptr.vmem [resolvable:$true] %s340_s11 }
  0x28   :  { %391 = vmatpush3.bf16.msra.mxu0 %v440_v1  ;;  %v448_v9 = vld [vmem:[#allocation3] sm:$0xff]   ;;  %v450_v11 = vld [vmem:[#allocation8 + $0x30] sm:$0xff]   ;;  %v451_v12 = vld [vmem:[#allocation8 + $0x28] sm:$0xff]   ;;  %s521_s12 = scalar_lea.vmem %s341_s11, 256  ;;  %p526_p2 = scmp.lt.s32.totalorder %s341_s11, %s341_s11 }
  0x29   :  { %392 = vmatprep.subr.bf16.mxu0 %v552_v0  ;;  %v449_v10 = vld [vmem:[#allocation8 + $0x38] sm:$0xff]   ;;  %v452_v13 = vld [vmem:[#allocation8 + $0x20] sm:$0xff]   ;;  %v454_v15 = vld [vmem:[#allocation8 + $0x10] sm:$0xff]   ;;  %p522_p1 = scmp.ne.s32.totalorder %s341_s11, %s521_s12  ;;  %p527_p3 = scmp.lt.s32.totalorder %s521_s12, %s521_s12 }
  0x2a   :  { %411 = vmatpush3.bf16.msra.mxu1 %v449_v10  ;;  %v453_v14 = vld [vmem:[#allocation8 + $0x18] sm:$0xff]   ;;  %v455_v16 = vld [vmem:[#allocation8 + $0x8] sm:$0xff]   ;;  %v456_v17 = vld [vmem:[#allocation8] sm:$0xff]  }
  0x2b   :  { %412 = vmatprep.subr.bf16.mxu1 %v552_v0  ;;  %v353_v18 = vld [vmem:[%s607_s2] ss:$0 sm:$0xff]  ;;  %p528_p4 = por %p527_p3, %p526_p2 }
  0x2c   :  { %393 = vmatpush3.bf16.msra.mxu0 %v441_v2  ;;  %v371_v44 = vld [vmem:[%s609_s4] ss:$0 sm:$0xff] }
  0x2d   :  { %394 = vmatprep.subr.bf16.mxu0 %v552_v0  ;;  %p529_p5 = pnand %p528_p4, %p522_p1 }
  0x2e   :  { %413 = vmatpush3.bf16.msra.mxu1 %v450_v11 }
  0x2f   :  { %414 = vmatprep.subr.bf16.mxu1 %v552_v0 }
  0x30   :  { %395 = vmatpush3.bf16.msra.mxu0 %v442_v3 }
  0x31   :  { %396 = vmatprep.subr.bf16.mxu0 %v552_v0 }
  0x32   :  { %415 = vmatpush3.bf16.msra.mxu1 %v451_v12 }
  0x33   :  { %416 = vmatprep.subr.bf16.mxu1 %v552_v0 }
  0x34   :  { %397 = vmatpush3.bf16.msra.mxu0 %v443_v4 }
  0x35   :  { %398 = vmatprep.subr.bf16.mxu0 %v552_v0 }
  0x36   :  { %417 = vmatpush3.bf16.msra.mxu1 %v452_v13 }
  0x37   :  { %418 = vmatprep.subr.bf16.mxu1 %v552_v0 }
  0x38   :  { %399 = vmatpush3.bf16.msra.mxu0 %v444_v5 }
  0x39   :  { %400 = vmatprep.subr.bf16.mxu0 %v552_v0 }
  0x3a   :  { %419 = vmatpush3.bf16.msra.mxu1 %v453_v14 }
  0x3b   :  { %420 = vmatprep.subr.bf16.mxu1 %v552_v0 }
  0x3c   :  { %401 = vmatpush3.bf16.msra.mxu0 %v445_v6 }
  0x3d   :  { %402 = vmatprep.subr.bf16.mxu0 %v552_v0 }
  0x3e   :  { %421 = vmatpush3.bf16.msra.mxu1 %v454_v15 }
  0x3f   :  { %422 = vmatprep.subr.bf16.mxu1 %v552_v0 }
  0x40   :  { %403 = vmatpush3.bf16.msra.mxu0 %v446_v7 }
  0x41   :  { %404 = vmatprep.subr.bf16.mxu0 %v552_v0 }
  0x42   :  { %423 = vmatpush3.bf16.msra.mxu1 %v455_v16 }
  0x43   :  { %424 = vmatprep.subr.bf16.mxu1 %v552_v0 }
  0x44   :  { %405 = vmatpush3.bf16.msra.mxu0 %v447_v8 }
  0x46   :  { %425 = vmatpush3.bf16.msra.mxu1 %v456_v17 }
  0x47   :  { %407 = vmatmul.mubr.bf16.vlgmr.msra.gmra.mxu0 %v448_v9 }
 0x107   :  { %v182_v19 = vpop.f32.mrf.mxu0 }
 0x108   :  { %v183_v20 = vadd.f32 %v353_v18, %v182_v19 }
 0x109   :  { %v408_v21 = vpop.f32.mrf.mxu0 }
 0x10a   :  { %v189_v22 = vmul.f32 %v183_v20, %v183_v20 }
 0x10b   :  { %v185_v23 = vpop.f32.mrf.mxu0 }
 0x10c   :  { %v191_v24 = vmul.f32 %v189_v22, %v183_v20  ;;  %v186_v25 = vadd.f32 %v353_v18, %v185_v23 }
 0x10d   :  { %v409_v26 = vpop.f32.mrf.mxu0 }
 0x10e   :  { %v193_v27 = vmul.f32 0.044715, %v191_v24  ;;  %v190_v28 = vmul.f32 %v186_v25, %v186_v25 }
 0x110   :  { %v195_v29 = vadd.f32 %v193_v27, %v183_v20  ;;  %v192_v30 = vmul.f32 %v190_v28, %v186_v25 }
 0x112   :  { %v197_v31 = vmul.f32 0.7978846, %v195_v29  ;;  %v194_v32 = vmul.f32 0.044715, %v192_v30 }
 0x114   :  { %457 = vtanh.f32 %v197_v31  ;;  %v196_v33 = vadd.f32 %v194_v32, %v186_v25 }
 0x116   :  { %v198_v34 = vmul.f32 0.7978846, %v196_v33 }
 0x118   :  { %459 = vtanh.f32 %v198_v34 }
 0x121   :  { %v458_v35 = vpop.eup %457 }
 0x122   :  { %v201_v36 = vadd.f32 1.0, %v458_v35 }
 0x124   :  { %v203_v39 = vmul.f32 0.5, %v201_v36 }
 0x125   :  { %v460_v37 = vpop.eup %459 }
 0x126   :  { %v202_v38 = vadd.f32 1.0, %v460_v37  ;;  %v205_v41 = vmul.f32 %v203_v39, %v183_v20 }
 0x128   :  { %v204_v40 = vmul.f32 0.5, %v202_v38 }
 0x12a   :  { %v206_v42 = vmul.f32 %v204_v40, %v186_v25 }
 0x12c   :  { %v209_v43 = vpack.c.bf16 %v206_v42, %v205_v41 }
 0x12e   :  { %427 = vmatmul.mubr.bf16.vlgmr.msra.gmra.mxu1 %v209_v43 }
 0x1ee   :  { %v308_v45 = vpop.f32.mrf.mxu1 }
 0x1ef   :  { %v331_v46 = vadd.f32 %v371_v44, %v308_v45 }
 0x1f0   :  { %v428_v47 = vpop.f32.mrf.mxu1 }
 0x1f1   :  { %333 = vst [vmem:[#allocation9] sm:$0xff] %v331_v46 }
 0x1f2   :  { %v311_v48 = vpop.f32.mrf.mxu1 }
 0x1f3   :  { %v332_v49 = vadd.f32 %v371_v44, %v311_v48 }
 0x1f4   :  { %v429_v50 = vpop.f32.mrf.mxu1 }
 0x1f5   :  { %334 = vst [vmem:[#allocation9 + $0x8] sm:$0xff] %v332_v49 }
 0x1f6   :  { %532 = shalt.err (!%p529_p5)
}
 0x1f7   :  { %s555_s13 = smov 128   ;;  %s556_s4 = smov 8  }
 0x1f8   :  { %346 = dma.vmem_to_hbm [thread:$0]  %s341_s11, 256, %s610_s5, [#allocation5], %s555_s13, %s555_s13, %s556_s4  }
 0x1f9   :  { %545 = dma.done.wait [#allocation5], 256  }
 0x1fa   :  { %546 = vsyncadd [#allocation5], 4294967040 }
 0x1fb   :  { %350 = vsyncpa [#allocation4], 1 }
 0x1fc   :  { %351 = vsyncpa [#allocation7], 1 }
 0x1fd   :  { %352 = vsyncpa [#allocation5], 1 }

// kernel: tpu_custom_call.1
= control target key start
LH: loop header
LB: loop body
LE: loop exit
PB: predicated region body
PF: predicated region fallthrough
CT: control target
= control target key end

     0   :  { %10 = vsyncpa [#allocation4], 0  ;;  %s605_s0 = inlined_call_operand.hbm [shape: bf16[16,128], index: 0, kind: input, shape index: {}]   ;;  %s606_s1 = inlined_call_operand.hbm [shape: bf16[128,128], index: 1, kind: input, shape index: {}]   ;;  %s607_s2 = inlined_call_operand.vmem [shape: f32[1,128], index: 2, kind: input, shape index: {}]   ;;  %s608_s3 = inlined_call_operand.hbm [shape: bf16[128,128], index: 3, kind: input, shape index: {}]   ;;  %s609_s4 = inlined_call_operand.vmem [shape: f32[1,128], index: 4, kind: input, shape index: {}]   ;;  %s610_s5 = inlined_call_operand.hbm [shape: f32[16,128], index: 5, kind: output, shape index: {}]  }
   0x1   :  { %11 = vsyncpa [#allocation7], 0 }
   0x2   :  { %12 = vsyncpa [#allocation5], 0  ;;  %s547_s18 = smov [#allocation6]   ;;  %s548_s20 = smov [#allocation3]  }
   0x3   :  { %s30_s19 = sshll.u32 %s547_s18, 4  ;;  %s18_s21 = sshll.u32 %s548_s20, 4  ;;  %s31_s19 = int_to_ptr.vmem [resolvable:$true] %s30_s19  ;;  %s19_s21 = int_to_ptr.vmem [resolvable:$true] %s18_s21 }
   0x4   :  { %s469_s22 = scalar_lea.vmem %s31_s19, 1024  ;;  %p474_p1 = scmp.lt.s32.totalorder %s31_s19, %s31_s19 }
   0x5   :  { %p470_p0 = scmp.ne.s32.totalorder %s31_s19, %s469_s22  ;;  %p475_p2 = scmp.lt.s32.totalorder %s469_s22, %s469_s22 }
   0x7   :  { %p476_p3 = por %p475_p2, %p474_p1 }
   0x9   :  { %p477_p4 = pnand %p476_p3, %p470_p0 }
   0xb   :  { %480 = shalt.err (!%p477_p4)
}
   0xc   :  { %s549_s23 = smov 64   ;;  %s550_s24 = smov 4  }
   0xd   :  { %36 = dma.hbm_to_vmem [thread:$0]  %s606_s1, 1024, %s31_s19, [#allocation7], %s549_s23, %s549_s23, %s550_s24  }
   0xe   :  { %s489_s27 = scalar_lea.vmem %s19_s21, 128  ;;  %p494_p6 = scmp.lt.s32.totalorder %s19_s21, %s19_s21 }
   0xf   :  { %p490_p5 = scmp.ne.s32.totalorder %s19_s21, %s489_s27  ;;  %p495_p7 = scmp.lt.s32.totalorder %s489_s27, %s489_s27 }
  0x11   :  { %p496_p8 = por %p495_p7, %p494_p6 }
  0x13   :  { %p497_p9 = pnand %p496_p8, %p490_p5 }
  0x15   :  { %500 = shalt.err (!%p497_p9)
}
  0x16   :  { %24 = dma.hbm_to_vmem [thread:$0]  %s605_s0, 128, %s19_s21, [#allocation4], %s549_s23, %s549_s23, %s550_s24  }
  0x17   :  { %s551_s30 = smov [#allocation8]  }
  0x18   :  { %s44_s6 = sshll.u32 %s551_s30, 4  ;;  %s45_s6 = int_to_ptr.vmem [resolvable:$true] %s44_s6 }
  0x19   :  { %s509_s7 = scalar_lea.vmem %s45_s6, 1024  ;;  %p514_p11 = scmp.lt.s32.totalorder %s45_s6, %s45_s6 }
  0x1a   :  { %p510_p10 = scmp.ne.s32.totalorder %s45_s6, %s509_s7  ;;  %p515_p12 = scmp.lt.s32.totalorder %s509_s7, %s509_s7 }
  0x1c   :  { %p516_p13 = por %p515_p12, %p514_p11 }
  0x1e   :  { %p517_p0 = pnand %p516_p13, %p510_p10 }
  0x20   :  { %520 = shalt.err (!%p517_p0)
}
  0x21   :  { %50 = dma.hbm_to_vmem [thread:$0]  %s608_s3, 1024, %s45_s6, [#allocation7], %s549_s23, %s549_s23, %s550_s24  }
  0x22   :  { %541 = dma.done.wait [#allocation4], 128  }
  0x23   :  { %542 = vsyncadd [#allocation4], 4294967168 }
  0x24   :  { %543 = dma.done.wait [#allocation7], 2048  }
  0x25   :  { %544 = vsyncadd [#allocation7], 4294965248  ;;  %v552_v0 = vmov 0.0   ;;  %vm553_vm0 = vmmov 0   ;;  %v440_v1 = vld [vmem:[#allocation6 + $0x38] sm:$0xff]   ;;  %v441_v2 = vld [vmem:[#allocation6 + $0x30] sm:$0xff]  }
  0x26   :  { %390 = vmatprep.subr.bf16.mxu0 %v552_v0  ;;  %406 = vmatprep.mubr.msk.bf16.mxu0 %vm553_vm0, %v552_v0  ;;  %v442_v3 = vld [vmem:[#allocation6 + $0x28] sm:$0xff]   ;;  %v443_v4 = vld [vmem:[#allocation6 + $0x20] sm:$0xff]   ;;  %v444_v5 = vld [vmem:[#allocation6 + $0x18] sm:$0xff]   ;;  %s554_s10 = smov [#allocation9]  }
  0x27   :  { %410 = vmatprep.subr.bf16.mxu1 %v552_v0  ;;  %426 = vmatprep.mubr.msk.bf16.mxu1 %vm553_vm0, %v552_v0  ;;  %v445_v6 = vld [vmem:[#allocation6 + $0x10] sm:$0xff]   ;;  %v446_v7 = vld [vmem:[#allocation6 + $0x8] sm:$0xff]   ;;  %v447_v8 = vld [vmem:[#allocation6] sm:$0xff]   ;;  %s340_s11 = sshll.u32 %s554_s10, 4  ;;  %s341_s11 = int_to_ptr.vmem [resolvable:$true] %s340_s11 }
  0x28   :  { %391 = vmatpush3.bf16.msra.mxu0 %v440_v1  ;;  %v448_v9 = vld [vmem:[#allocation3] sm:$0xff]   ;;  %v450_v11 = vld [vmem:[#allocation8 + $0x30] sm:$0xff]   ;;  %v451_v12 = vld [vmem:[#allocation8 + $0x28] sm:$0xff]   ;;  %s521_s12 = scalar_lea.vmem %s341_s11, 256  ;;  %p526_p2 = scmp.lt.s32.totalorder %s341_s11, %s341_s11 }
  0x29   :  { %392 = vmatprep.subr.bf16.mxu0 %v552_v0  ;;  %v449_v10 = vld [vmem:[#allocation8 + $0x38] sm:$0xff]   ;;  %v452_v13 = vld [vmem:[#allocation8 + $0x20] sm:$0xff]   ;;  %v454_v15 = vld [vmem:[#allocation8 + $0x10] sm:$0xff]   ;;  %p522_p1 = scmp.ne.s32.totalorder %s341_s11, %s521_s12  ;;  %p527_p3 = scmp.lt.s32.totalorder %s521_s12, %s521_s12 }
  0x2a   :  { %411 = vmatpush3.bf16.msra.mxu1 %v449_v10  ;;  %v453_v14 = vld [vmem:[#allocation8 + $0x18] sm:$0xff]   ;;  %v455_v16 = vld [vmem:[#allocation8 + $0x8] sm:$0xff]   ;;  %v456_v17 = vld [vmem:[#allocation8] sm:$0xff]  }
  0x2b   :  { %412 = vmatprep.subr.bf16.mxu1 %v552_v0  ;;  %v353_v18 = vld [vmem:[%s607_s2] ss:$0 sm:$0xff]  ;;  %p528_p4 = por %p527_p3, %p526_p2 }
  0x2c   :  { %393 = vmatpush3.bf16.msra.mxu0 %v441_v2  ;;  %v371_v44 = vld [vmem:[%s609_s4] ss:$0 sm:$0xff] }
  0x2d   :  { %394 = vmatprep.subr.bf16.mxu0 %v552_v0  ;;  %p529_p5 = pnand %p528_p4, %p522_p1 }
  0x2e   :  { %413 = vmatpush3.bf16.msra.mxu1 %v450_v11 }
  0x2f   :  { %414 = vmatprep.subr.bf16.mxu1 %v552_v0 }
  0x30   :  { %395 = vmatpush3.bf16.msra.mxu0 %v442_v3 }
  0x31   :  { %396 = vmatprep.subr.bf16.mxu0 %v552_v0 }
  0x32   :  { %415 = vmatpush3.bf16.msra.mxu1 %v451_v12 }
  0x33   :  { %416 = vmatprep.subr.bf16.mxu1 %v552_v0 }
  0x34   :  { %397 = vmatpush3.bf16.msra.mxu0 %v443_v4 }
  0x35   :  { %398 = vmatprep.subr.bf16.mxu0 %v552_v0 }
  0x36   :  { %417 = vmatpush3.bf16.msra.mxu1 %v452_v13 }
  0x37   :  { %418 = vmatprep.subr.bf16.mxu1 %v552_v0 }
  0x38   :  { %399 = vmatpush3.bf16.msra.mxu0 %v444_v5 }
  0x39   :  { %400 = vmatprep.subr.bf16.mxu0 %v552_v0 }
  0x3a   :  { %419 = vmatpush3.bf16.msra.mxu1 %v453_v14 }
  0x3b   :  { %420 = vmatprep.subr.bf16.mxu1 %v552_v0 }
  0x3c   :  { %401 = vmatpush3.bf16.msra.mxu0 %v445_v6 }
  0x3d   :  { %402 = vmatprep.subr.bf16.mxu0 %v552_v0 }
  0x3e   :  { %421 = vmatpush3.bf16.msra.mxu1 %v454_v15 }
  0x3f   :  { %422 = vmatprep.subr.bf16.mxu1 %v552_v0 }
  0x40   :  { %403 = vmatpush3.bf16.msra.mxu0 %v446_v7 }
  0x41   :  { %404 = vmatprep.subr.bf16.mxu0 %v552_v0 }
  0x42   :  { %423 = vmatpush3.bf16.msra.mxu1 %v455_v16 }
  0x43   :  { %424 = vmatprep.subr.bf16.mxu1 %v552_v0 }
  0x44   :  { %405 = vmatpush3.bf16.msra.mxu0 %v447_v8 }
  0x46   :  { %425 = vmatpush3.bf16.msra.mxu1 %v456_v17 }
  0x47   :  { %407 = vmatmul.mubr.bf16.vlgmr.msra.gmra.mxu0 %v448_v9 }
 0x107   :  { %v182_v19 = vpop.f32.mrf.mxu0 }
 0x108   :  { %v183_v20 = vadd.f32 %v353_v18, %v182_v19 }
 0x109   :  { %v408_v21 = vpop.f32.mrf.mxu0 }
 0x10a   :  { %v189_v22 = vmul.f32 %v183_v20, %v183_v20 }
 0x10b   :  { %v185_v23 = vpop.f32.mrf.mxu0 }
 0x10c   :  { %v191_v24 = vmul.f32 %v189_v22, %v183_v20  ;;  %v186_v25 = vadd.f32 %v353_v18, %v185_v23 }
 0x10d   :  { %v409_v26 = vpop.f32.mrf.mxu0 }
 0x10e   :  { %v193_v27 = vmul.f32 0.044715, %v191_v24  ;;  %v190_v28 = vmul.f32 %v186_v25, %v186_v25 }
 0x110   :  { %v195_v29 = vadd.f32 %v193_v27, %v183_v20  ;;  %v192_v30 = vmul.f32 %v190_v28, %v186_v25 }
 0x112   :  { %v197_v31 = vmul.f32 0.7978846, %v195_v29  ;;  %v194_v32 = vmul.f32 0.044715, %v192_v30 }
 0x114   :  { %457 = vtanh.f32 %v197_v31  ;;  %v196_v33 = vadd.f32 %v194_v32, %v186_v25 }
 0x116   :  { %v198_v34 = vmul.f32 0.7978846, %v196_v33 }
 0x118   :  { %459 = vtanh.f32 %v198_v34 }
 0x121   :  { %v458_v35 = vpop.eup %457 }
 0x122   :  { %v201_v36 = vadd.f32 1.0, %v458_v35 }
 0x124   :  { %v203_v39 = vmul.f32 0.5, %v201_v36 }
 0x125   :  { %v460_v37 = vpop.eup %459 }
 0x126   :  { %v202_v38 = vadd.f32 1.0, %v460_v37  ;;  %v205_v41 = vmul.f32 %v203_v39, %v183_v20 }
 0x128   :  { %v204_v40 = vmul.f32 0.5, %v202_v38 }
 0x12a   :  { %v206_v42 = vmul.f32 %v204_v40, %v186_v25 }
 0x12c   :  { %v209_v43 = vpack.c.bf16 %v206_v42, %v205_v41 }
 0x12e   :  { %427 = vmatmul.mubr.bf16.vlgmr.msra.gmra.mxu1 %v209_v43 }
 0x1ee   :  { %v308_v45 = vpop.f32.mrf.mxu1 }
 0x1ef   :  { %v331_v46 = vadd.f32 %v371_v44, %v308_v45 }
 0x1f0   :  { %v428_v47 = vpop.f32.mrf.mxu1 }
 0x1f1   :  { %333 = vst [vmem:[#allocation9] sm:$0xff] %v331_v46 }
 0x1f2   :  { %v311_v48 = vpop.f32.mrf.mxu1 }
 0x1f3   :  { %v332_v49 = vadd.f32 %v371_v44, %v311_v48 }
 0x1f4   :  { %v429_v50 = vpop.f32.mrf.mxu1 }
 0x1f5   :  { %334 = vst [vmem:[#allocation9 + $0x8] sm:$0xff] %v332_v49 }
 0x1f6   :  { %532 = shalt.err (!%p529_p5)
}
 0x1f7   :  { %s555_s13 = smov 128   ;;  %s556_s4 = smov 8  }
 0x1f8   :  { %346 = dma.vmem_to_hbm [thread:$0]  %s341_s11, 256, %s610_s5, [#allocation5], %s555_s13, %s555_s13, %s556_s4  }
 0x1f9   :  { %545 = dma.done.wait [#allocation5], 256  }
 0x1fa   :  { %546 = vsyncadd [#allocation5], 4294967040 }
 0x1fb   :  { %350 = vsyncpa [#allocation4], 1 }
 0x1fc   :  { %351 = vsyncpa [#allocation7], 1 }
 0x1fd   :  { %352 = vsyncpa [#allocation5], 1 }

</bundles_post_ra>
